<compile_context>
chip_gen: v7x
topology: tpu7x:2x2x1
jax: 0.10.0
libtpu: 0.0.40
codegen_flags: <defaults>
</compile_context>

<pallas_src>
import functools

import numpy as np

import jax
import jax.numpy as jnp
from jax.experimental import pallas as pl
from jax.experimental.pallas import tpu as pltpu


def _round_up(x, m):
    return ((x + m - 1) // m) * m


# ---------------------------------------------------------------------------
# Kernel 1: fused projection  h = x @ W, [h | 1], hoisted logit halves.
# ---------------------------------------------------------------------------
def _project_kernel(x_ref, w_ref, a2_ref, haug_ref, ssrc_ref, sdst_ref):
    h = jnp.dot(x_ref[...], w_ref[...],
                preferred_element_type=jnp.float32)          # (tp, F)
    a_src = a2_ref[0:1, :]                                   # (1, F)
    a_dst = a2_ref[1:2, :]                                   # (1, F)
    # Per-node logit halves via VPU multiply + cross-lane reduce.
    ssrc_ref[...] = jnp.sum(h * a_src, axis=-1, keepdims=True)      # (tp, 1)
    sdst_ref[...] = jnp.sum(h * a_dst, axis=-1, keepdims=True).T    # (1, tp)
    # Ones-augmented h in the aggregation dtype (bf16-capable): columns
    # [0, F) = h, column F = 1, so kernel 2's matmul yields numerator + row-sum.
    tp, fout = h.shape
    haug_ref[:, :fout] = h.astype(haug_ref.dtype)
    haug_ref[:, fout:] = jnp.ones((tp, 1), dtype=haug_ref.dtype)


# ---------------------------------------------------------------------------
# Kernel 2: masked attention + normalized aggregation, (rows x neighbor-tiles).
# ---------------------------------------------------------------------------
def _gat_attn_kernel(ssrc_ref, sdst_ref, adj_ref, haug_ref, out_ref, acc_ref, *,
                     alpha, concat, fout):
    j = pl.program_id(1)

    @pl.when(j == 0)
    def _():
        acc_ref[...] = jnp.zeros_like(acc_ref)

    logits = ssrc_ref[...] + sdst_ref[...]                   # (tm, tn)
    # -leakyrelu(x) == min(-x, -alpha*x): one fewer VPU op than cmp+select.
    neg_leaky = jnp.minimum(-logits, (-alpha) * logits)
    # NOTE: matches the PyTorch SpGAT formulation (no max-subtraction); the
    # where-select (not a multiply) keeps non-edges exactly 0 even on overflow.
    e = jnp.where(adj_ref[...] != 0, jnp.exp(neg_leaky), 0.0)

    # One MXU pass over [h | 1]: partial numerator (tm, F) and row-sum (tm, 1).
    acc_ref[...] += jnp.dot(e.astype(haug_ref.dtype), haug_ref[...],
                            preferred_element_type=jnp.float32)

    @pl.when(j == pl.num_programs(1) - 1)
    def _():
        agg = acc_ref[...]
        numer = agg[:, :fout]
        denom = jnp.maximum(agg[:, fout:fout + 1], 1e-30)    # isolated rows -> 0
        # EUP approximate reciprocal + one Newton step (~f32-exact).
        r = pl.reciprocal(denom, approx=True)
        r = r * (2.0 - denom * r)
        h_prime = numer * r
        if concat:
            out_ref[...] = jnp.where(h_prime > 0, h_prime, jnp.exp(h_prime) - 1.0)
        else:
            out_ref[...] = h_prime


# ---------------------------------------------------------------------------
# Tiling / VMEM heuristics.
# ---------------------------------------------------------------------------
def _vmem_budget_and_limit():
    """Generation-aware VMEM budget/limit (bytes)."""
    try:
        cap = pltpu.get_tpu_info().vmem_capacity_bytes
    except Exception:
        cap = None
    if cap is not None and cap >= 96 * 1024 * 1024:
        # v5e / v6e: 128 MiB VMEM per core.
        return 96 * 1024 * 1024, 100 * 1024 * 1024
    # v7x (64 MiB per TC) or unknown: stay conservative.
    return 40 * 1024 * 1024, 48 * 1024 * 1024


def _kernel2_vmem_bytes(tm, tn, faug_pad, fout_pad, agg_bytes):
    adj = 2 * tm * tn                        # int8 tile, double-buffered
    ssrc = 2 * tm * 128 * 4                  # (tm, 1) lane-padded f32
    sdst = 2 * 8 * tn * 4                    # (1, tn) sublane-padded f32
    haug = 2 * tn * faug_pad * agg_bytes     # [h | 1] tile, double-buffered
    out = 2 * tm * fout_pad * 4              # output tile
    acc = tm * faug_pad * 4                  # f32 accumulator scratch
    temps = 5 * tm * tn * 4                  # logits / e / mask temporaries
    return adj + ssrc + sdst + haug + out + acc + temps


def _choose_tiles(np_nodes, fout, faug, agg_bytes, budget):
    faug_pad = _round_up(faug, 128)
    fout_pad = _round_up(fout, 128)
    # Row tile: MXU-shaped, never below 128; prefer 256 while keeping >= 2
    # steps on the parallel axis (feeds both TensorCores on multi-core chips).
    tm = 256 if (np_nodes % 256 == 0 and np_nodes >= 512) else 128
    tm = min(tm, np_nodes)
    # Neighbor/contraction tile: as wide as the budget allows, dividing Np.
    if _kernel2_vmem_bytes(tm, np_nodes, faug_pad, fout_pad, agg_bytes) <= budget:
        return tm, np_nodes
    m = np_nodes // tm
    best_k = 1
    for k in range(1, m + 1):
        if m % k == 0 and _kernel2_vmem_bytes(tm, k * tm, faug_pad, fout_pad,
                                              agg_bytes) <= budget:
            best_k = k
    return tm, best_k * tm


def _choose_proj_tile(np_nodes):
    # Kernel 1's working set is tiny; use a large row tile independent of tm.
    for cand in (512, 256, 128):
        if np_nodes % cand == 0:
            return cand
    return np_nodes


# ---------------------------------------------------------------------------
# Public wrapper.
# ---------------------------------------------------------------------------
def sp_graph_attention_layer(x, adj, W, a, *, alpha, concat=True,
                             agg_dtype=jnp.float32):
    """Forward pass of SpGraphAttentionLayer (eval mode) with a dense adj mask.

    agg_dtype: set to jnp.bfloat16 on v6e/v7x for 2x MXU rate and half-size
    [h|1] / e tiles (accumulation stays f32); keep f32 on v5e or when exact
    parity with the f32 reference is required.
    """
    N, Fin = x.shape
    Fout = W.shape[1]
    Faug = Fout + 1

    budget, vmem_limit = _vmem_budget_and_limit()
    agg_bytes = int(np.dtype(agg_dtype).itemsize)

    # Stream the adjacency mask as int8 (4x less HBM traffic / VMEM).
    if adj.dtype != jnp.int8:
        adj = (adj != 0).astype(jnp.int8)

    # Pad the node dimension to a multiple of 128 so tiles stay MXU-shaped for
    # any N.  Padded rows/columns carry no edges and are sliced off at the end.
    Np = _round_up(N, 128)
    if Np != N:
        x = jnp.pad(x, ((0, Np - N), (0, 0)))
        adj = jnp.pad(adj, ((0, Np - N), (0, Np - N)))

    # a is (1, 2*Fout) -> (2, Fout): row 0 = source half, row 1 = dest half.
    a2 = a.reshape(2, Fout)

    tm, tn = _choose_tiles(Np, Fout, Faug, agg_bytes, budget)
    tproj = _choose_proj_tile(Np)

    # Kernel 1: fused projection (own large row tile, independent of tm).
    haug, ssrc, sdst = pl.pallas_call(
        _project_kernel,
        out_shape=(jax.ShapeDtypeStruct((Np, Faug), agg_dtype),
                   jax.ShapeDtypeStruct((Np, 1), jnp.float32),
                   jax.ShapeDtypeStruct((1, Np), jnp.float32)),
        grid=(Np // tproj,),
        in_specs=[pl.BlockSpec((tproj, Fin), lambda i: (i, 0)),    # x rows
                  pl.BlockSpec((Fin, Fout), lambda i: (0, 0)),     # W (resident)
                  pl.BlockSpec((2, Fout), lambda i: (0, 0))],      # a halves
        out_specs=(pl.BlockSpec((tproj, Faug), lambda i: (i, 0)),  # [h | 1]
                   pl.BlockSpec((tproj, 1), lambda i: (i, 0)),     # s_src
                   pl.BlockSpec((1, tproj), lambda i: (0, i))),    # s_dst row
        compiler_params=pltpu.CompilerParams(
            dimension_semantics=("parallel",),
            vmem_limit_bytes=vmem_limit),
    )(x, W, a2)

    kernel = functools.partial(_gat_attn_kernel, alpha=float(alpha),
                               concat=concat, fout=Fout)

    # Kernel 2: masked attention + aggregation, 2-D grid (row tiles x neighbor
    # tiles).  The neighbor axis is the reduction axis (last, "arbitrary").
    out = pl.pallas_call(
        kernel,
        out_shape=jax.ShapeDtypeStruct((Np, Fout), jnp.float32),
        grid=(Np // tm, Np // tn),
        in_specs=[pl.BlockSpec((tm, 1), lambda i, j: (i, 0)),      # s_src
                  pl.BlockSpec((1, tn), lambda i, j: (0, j)),      # s_dst
                  pl.BlockSpec((tm, tn), lambda i, j: (i, j)),     # adj (int8)
                  pl.BlockSpec((tn, Faug), lambda i, j: (j, 0))],  # [h | 1]
        out_specs=pl.BlockSpec((tm, Fout), lambda i, j: (i, 0)),
        scratch_shapes=[pltpu.VMEM((tm, Faug), jnp.float32)],
        compiler_params=pltpu.CompilerParams(
            dimension_semantics=("parallel", "arbitrary"),
            vmem_limit_bytes=vmem_limit),
    )(ssrc, sdst, adj, haug)

    return out[:N] if Np != N else out


if __name__ == "__main__":
    key = jax.random.PRNGKey(0)
    N, Fin, Fout = 64, 32, 32
    alpha = 0.2  # LeakyReLU negative slope
    concat = True

    k1, k2, k3, k4 = jax.random.split(key, 4)

    # Deterministic xavier_normal_ init (gain = 1.414), matching __init__ shapes.
    std_W = 1.414 * (2.0 / (Fin + Fout)) ** 0.5
    W = std_W * jax.random.normal(k1, (Fin, Fout), dtype=jnp.float32)
    std_a = 1.414 * (2.0 / (1 + 2 * Fout)) ** 0.5
    a = std_a * jax.random.normal(k2, (1, 2 * Fout), dtype=jnp.float32)

    x = jax.random.normal(k3, (N, Fin), dtype=jnp.float32)

    # Random sparse adjacency with self-loops (every row has >= 1 edge), int8.
    adj = (jax.random.uniform(k4, (N, N)) < 0.2).astype(jnp.int8)
    adj = jnp.maximum(adj, jnp.eye(N, dtype=jnp.int8))

    out = sp_graph_attention_layer(x, adj, W, a, alpha=alpha, concat=concat)
    out = jax.block_until_ready(out)

    # Pure-JAX reference (same dense-mask formulation as the sparse PyTorch code).
    h_ref = x @ W
    s1 = h_ref @ a[0, :Fout]
    s2 = h_ref @ a[0, Fout:]
    logits = s1[:, None] + s2[None, :]
    leaky = jnp.where(logits > 0, logits, alpha * logits)
    e = jnp.exp(-leaky) * (adj != 0)
    hp = (e @ h_ref) / e.sum(-1, keepdims=True)
    ref = jnp.where(hp > 0, hp, jnp.exp(hp) - 1.0)

    assert out.shape == (N, Fout), "bad output shape"
    assert jnp.allclose(out, ref, atol=2e-4, rtol=2e-4), "mismatch vs reference"
    print("KERNEL_OK")
</pallas_src>

<mosaic_0001>
module attributes {stable_mosaic.version = 11 : i64} {
  func.func @_project_kernel(%arg0: i32, %arg1: memref<128x32xf32, #tpu.memory_space<vmem>>, %arg2: memref<32x32xf32, #tpu.memory_space<vmem>>, %arg3: memref<2x32xf32, #tpu.memory_space<vmem>>, %arg4: memref<128x33xf32, #tpu.memory_space<vmem>>, %arg5: memref<128x1xf32, #tpu.memory_space<vmem>>, %arg6: memref<1x128xf32, #tpu.memory_space<vmem>>) attributes {dimension_semantics = [#tpu.dimension_semantics<parallel>], iteration_bounds = array<i64: 1>, scalar_prefetch = 0 : i64, scratch_operands = 0 : i64, tpu.core_type = #tpu.core_type<tc>, window_params = [{transform_indices = @transform_0, window_bounds = array<i64: 128, 32>}, {pipeline_mode = #tpu.pipeline_mode<synchronous>, transform_indices = @transform_1, window_bounds = array<i64: 32, 32>}, {pipeline_mode = #tpu.pipeline_mode<synchronous>, transform_indices = @transform_2, window_bounds = array<i64: 2, 32>}, {transform_indices = @transform_3, window_bounds = array<i64: 128, 33>}, {transform_indices = @transform_4, window_bounds = array<i64: 128, 1>}, {transform_indices = @transform_5, window_bounds = array<i64: 1, 128>}]} {
    %c0 = arith.constant 0 : index
    %c0_0 = arith.constant 0 : index
    %0 = vector.load %arg1[%c0, %c0_0] : memref<128x32xf32, #tpu.memory_space<vmem>>, vector<128x32xf32>
    %c0_1 = arith.constant 0 : index
    %c0_2 = arith.constant 0 : index
    %1 = vector.load %arg2[%c0_1, %c0_2] : memref<32x32xf32, #tpu.memory_space<vmem>>, vector<32x32xf32>
    %cst = arith.constant dense<0.000000e+00> : vector<128x32xf32>
    %2 = tpu.matmul %0, %1, %cst {dimension_numbers = #tpu.dot_dimension_numbers<[1], [0], [0], [1], [0, 0, 1, 1], [], []>} : vector<128x32xf32>, vector<32x32xf32>, vector<128x32xf32> -> vector<128x32xf32>
    %c0_3 = arith.constant 0 : index
    %c0_4 = arith.constant 0 : index
    %3 = vector.load %arg3[%c0_3, %c0_4] : memref<2x32xf32, #tpu.memory_space<vmem>>, vector<1x32xf32>
    %c1 = arith.constant 1 : index
    %c0_5 = arith.constant 0 : index
    %4 = vector.load %arg3[%c1, %c0_5] : memref<2x32xf32, #tpu.memory_space<vmem>>, vector<1x32xf32>
    %5 = vector.broadcast %3 : vector<1x32xf32> to vector<128x32xf32>
    %6 = arith.mulf %2, %5 : vector<128x32xf32>
    %cst_6 = arith.constant dense<0.000000e+00> : vector<128xf32>
    %7 = vector.multi_reduction <add>, %6, %cst_6 [1] : vector<128x32xf32> to vector<128xf32>
    %8 = vector.shape_cast %7 : vector<128xf32> to vector<128x1xf32>
    %c0_7 = arith.constant 0 : index
    %c0_8 = arith.constant 0 : index
    %9 = vector.load %arg5[%c0_7, %c0_8] : memref<128x1xf32, #tpu.memory_space<vmem>>, vector<128x1xf32>
    tpu.vector_store %arg5[%c0_7, %c0_8], %8 {strides = array<i32>} : memref<128x1xf32, #tpu.memory_space<vmem>>, vector<128x1xf32>,
    %10 = vector.broadcast %4 : vector<1x32xf32> to vector<128x32xf32>
    %11 = arith.mulf %2, %10 : vector<128x32xf32>
    %cst_9 = arith.constant dense<0.000000e+00> : vector<128xf32>
    %12 = vector.multi_reduction <add>, %11, %cst_9 [1] : vector<128x32xf32> to vector<128xf32>
    %13 = vector.shape_cast %12 : vector<128xf32> to vector<128x1xf32>
    %14 = tpu.transpose %13, [1, 0] : vector<128x1xf32> -> vector<1x128xf32>
    %c0_10 = arith.constant 0 : index
    %c0_11 = arith.constant 0 : index
    %15 = vector.load %arg6[%c0_10, %c0_11] : memref<1x128xf32, #tpu.memory_space<vmem>>, vector<1x128xf32>
    tpu.vector_store %arg6[%c0_10, %c0_11], %14 {strides = array<i32>} : memref<1x128xf32, #tpu.memory_space<vmem>>, vector<1x128xf32>,
    %c0_12 = arith.constant 0 : index
    %c0_13 = arith.constant 0 : index
    %16 = vector.load %arg4[%c0_12, %c0_13] : memref<128x33xf32, #tpu.memory_space<vmem>>, vector<128x32xf32>
    tpu.vector_store %arg4[%c0_12, %c0_13], %2 {strides = array<i32>} : memref<128x33xf32, #tpu.memory_space<vmem>>, vector<128x32xf32>,
    %cst_14 = arith.constant 1.000000e+00 : f32
    %17 = vector.broadcast %cst_14 : f32 to vector<128x1xf32>
    %c0_15 = arith.constant 0 : index
    %c32 = arith.constant 32 : index
    %18 = vector.load %arg4[%c0_15, %c32] : memref<128x33xf32, #tpu.memory_space<vmem>>, vector<128x1xf32>
    tpu.vector_store %arg4[%c0_15, %c32], %17 {strides = array<i32>} : memref<128x33xf32, #tpu.memory_space<vmem>>, vector<128x1xf32>,
    return
  }
  func.func @transform_0(%arg0: i32) -> (i32, i32) {
    %c0_i32 = arith.constant 0 : i32
    %c0_i32_0 = arith.constant 0 : i32
    return %arg0, %c0_i32 : i32, i32
  }
  func.func @transform_1(%arg0: i32) -> (i32, i32) {
    %c0_i32 = arith.constant 0 : i32
    %c0_i32_0 = arith.constant 0 : i32
    %c0_i32_1 = arith.constant 0 : i32
    return %c0_i32, %c0_i32_0 : i32, i32
  }
  func.func @transform_2(%arg0: i32) -> (i32, i32) {
    %c0_i32 = arith.constant 0 : i32
    %c0_i32_0 = arith.constant 0 : i32
    %c0_i32_1 = arith.constant 0 : i32
    return %c0_i32, %c0_i32_0 : i32, i32
  }
  func.func @transform_3(%arg0: i32) -> (i32, i32) {
    %c0_i32 = arith.constant 0 : i32
    %c0_i32_0 = arith.constant 0 : i32
    return %arg0, %c0_i32 : i32, i32
  }
  func.func @transform_4(%arg0: i32) -> (i32, i32) {
    %c0_i32 = arith.constant 0 : i32
    %c0_i32_0 = arith.constant 0 : i32
    return %arg0, %c0_i32 : i32, i32
  }
  func.func @transform_5(%arg0: i32) -> (i32, i32) {
    %c0_i32 = arith.constant 0 : i32
    %c0_i32_0 = arith.constant 0 : i32
    return %c0_i32, %arg0 : i32, i32
  }
}

</mosaic_0001>

<bundles_post_ra>
// kernel: tpu_custom_call.1
= control target key start
LH: loop header
LB: loop body
LE: loop exit
PB: predicated region body
PF: predicated region fallthrough
CT: control target
= control target key end

     0   :  { %vm38_vm0 = vcmask 261120   ;;  %s1044_s0 = inlined_call_operand.vmem [shape: f32[128,32], index: 0, kind: input, shape index: {}]   ;;  %s1045_s1 = inlined_call_operand.vmem [shape: f32[32,32], index: 1, kind: input, shape index: {}]   ;;  %s1046_s2 = inlined_call_operand.vmem [shape: f32[2,32], index: 2, kind: input, shape index: {}]   ;;  %s1047_s3 = inlined_call_operand.vmem [shape: f32[128,33], index: 3, kind: output, shape index: {0}]   ;;  %s1048_s4 = inlined_call_operand.vmem [shape: f32[128,1], index: 4, kind: output, shape index: {1}]   ;;  %s1049_s5 = inlined_call_operand.hbm [shape: f32[1,128], index: 5, kind: output, shape index: {2}]  }
   0x1   :  { %v34_v0 = vld [vmem:[%s1045_s1] sm:$0xff]  ;;  %v35_v1 = vld [vmem:[%s1045_s1 + $0x8] sm:$0xff]  ;;  %v36_v2 = vld [vmem:[%s1045_s1 + $0x10] sm:$0xff] }
   0x2   :  { %v545_v3 = vpack.c.bf16 %v35_v1, %v34_v0  ;;  %v37_v4 = vld [vmem:[%s1045_s1 + $0x18] sm:$0xff]  ;;  %v18_v5 = vld [vmem:[%s1044_s0] sm:$0xff] }
   0x3   :  { %v549_v6 = vpack.c.bf16 %v37_v4, %v36_v2  ;;  %521 = vmatprep.mubr.msk.f32.mxu0 %vm38_vm0, %v18_v5  ;;  %v26_v7 = vld [vmem:[%s1044_s0 + $0x40] sm:$0xff] }
   0x4   :  { %546 = vmatprep.subr.bf16.mxu0 %v545_v3  ;;  %553 = vmatprep.subr.bf16.mxu1 %v545_v3 }
   0x5   :  { %548 = vmatpush3.bf16.msra.mxu0 %v545_v3  ;;  %555 = vmatpush3.bf16.msra.mxu1 %v545_v3 }
   0x6   :  { %550 = vmatprep.subr.bf16.mxu0 %v549_v6  ;;  %554 = vmatprep.subr.bf16.mxu1 %v549_v6 }
   0x7   :  { %533 = vmatprep.mubr.msk.f32.mxu1 %vm38_vm0, %v26_v7 }
   0x8   :  { %11 = vsyncpa [#allocation3], 0  ;;  %v19_v8 = vld [vmem:[%s1044_s0 + $0x8] sm:$0xff]  ;;  %v20_v10 = vld [vmem:[%s1044_s0 + $0x10] sm:$0xff]  ;;  %vm436_vm1 = vcmask 269568   ;;  %v583_v28 = vmov 1.0  }
   0x9   :  { %552 = vmatpush3.bf16.msra.mxu0 %v549_v6  ;;  %556 = vmatpush3.bf16.msra.mxu1 %v549_v6  ;;  %v27_v9 = vld [vmem:[%s1044_s0 + $0x48] sm:$0xff]  ;;  %v28_v11 = vld [vmem:[%s1044_s0 + $0x50] sm:$0xff]  ;;  %v21_v12 = vld [vmem:[%s1044_s0 + $0x18] sm:$0xff]  ;;  %vm302_vm2 = vcmask 7168   ;;  %s584_s20 = smov [#allocation2]  }
   0xa   :  { %v29_v13 = vld [vmem:[%s1044_s0 + $0x58] sm:$0xff]  ;;  %v22_v14 = vld [vmem:[%s1044_s0 + $0x20] sm:$0xff]  ;;  %v23_v16 = vld [vmem:[%s1044_s0 + $0x28] sm:$0xff]  ;;  %s463_s21 = sshll.u32 %s584_s20, 4  ;;  %s464_s21 = int_to_ptr.vmem [resolvable:$true] %s463_s21 }
   0xb   :  { %v30_v15 = vld [vmem:[%s1044_s0 + $0x60] sm:$0xff]  ;;  %v31_v17 = vld [vmem:[%s1044_s0 + $0x68] sm:$0xff]  ;;  %v24_v18 = vld [vmem:[%s1044_s0 + $0x30] sm:$0xff]  ;;  %s559_s22 = scalar_lea.vmem %s464_s21, 16  ;;  %s563_s23 = scalar_lea.vmem %s464_s21, 32 }
   0xc   :  { %522 = vmatmul.mubr.msk.f32.vlgmr.msra.gmra.mrb[0].mxu0 %vm38_vm0, %v19_v8  ;;  %534 = vmatmul.mubr.msk.f32.vlgmr.msra.gmra.mrb[0].mxu1 %vm38_vm0, %v27_v9  ;;  %v32_v19 = vld [vmem:[%s1044_s0 + $0x70] sm:$0xff]  ;;  %v25_v20 = vld [vmem:[%s1044_s0 + $0x38] sm:$0xff]  ;;  %v694_v22 = vld [vmem:[%s1046_s2 + $0x1] ss:$0 sm:$0xff]  ;;  %p560_p0 = scmp.ne.s32.totalorder %s464_s21, %s559_s22  ;;  %p564_p1 = scmp.lt.s32.totalorder %s464_s21, %s464_s21 }
   0xd   :  { %524 = vmatprep.mubr.msk.f32.mxu0 %vm38_vm0, %v20_v10  ;;  %536 = vmatprep.mubr.msk.f32.mxu1 %vm38_vm0, %v28_v11  ;;  %v33_v21 = vld [vmem:[%s1044_s0 + $0x78] sm:$0xff]  ;;  %v902_v60 = vld [vmem:[%s1046_s2] ss:$0 sm:$0xff]  ;;  %p565_p2 = scmp.lt.s32.totalorder %s563_s23, %s559_s22 }
   0xf   :  { %p566_p3 = por %p565_p2, %p564_p1 }
  0x10   :  { %525 = vmatmul.mubr.msk.f32.gmra.mrb[2].mxu0 %vm38_vm0, %v21_v12  ;;  %537 = vmatmul.mubr.msk.f32.gmra.mrb[2].mxu1 %vm38_vm0, %v29_v13 }
  0x11   :  { %527 = vmatprep.mubr.msk.f32.mxu0 %vm38_vm0, %v22_v14  ;;  %539 = vmatprep.mubr.msk.f32.mxu1 %vm38_vm0, %v30_v15  ;;  %p567_p4 = pnand %p566_p3, %p560_p0 }
  0x14   :  { %528 = vmatmul.mubr.msk.f32.gmra.mrb[4].mxu0 %vm38_vm0, %v23_v16  ;;  %540 = vmatmul.mubr.msk.f32.gmra.mrb[4].mxu1 %vm38_vm0, %v31_v17 }
  0x15   :  { %530 = vmatprep.mubr.msk.f32.mxu0 %vm38_vm0, %v24_v18  ;;  %542 = vmatprep.mubr.msk.f32.mxu1 %vm38_vm0, %v32_v19 }
  0x18   :  { %531 = vmatmul.mubr.msk.f32.gmra.mrb[6].mxu0 %vm38_vm0, %v25_v20  ;;  %543 = vmatmul.mubr.msk.f32.gmra.mrb[6].mxu1 %vm38_vm0, %v33_v21 }
  0xdf   :  { %v696_v23 = vpop.f32.mrb[0].mxu0  ;;  %v698_v24 = vpop.f32.mrb[0].mxu1 }
  0xe0   :  { %421 = vst.msk [vmem:[%s1047_s3 + $0x8] sm:$0xff] %vm38_vm0, %v696_v23  ;;  %v705_v25 = vpop.f32.mrb[1].mxu0  ;;  %v324_v26 = vmul.f32 %v696_v23, %v694_v22  ;;  %429 = vst.msk [vmem:[%s1047_s3 + $0x48] sm:$0xff] %vm38_vm0, %v698_v24  ;;  %v714_v27 = vpop.f32.mrb[1].mxu1  ;;  %v332_v59 = vmul.f32 %v698_v24, %v694_v22  ;;  %v239_v12 = vmul.f32 %v696_v23, %v902_v60 }
  0xe1   :  { %438 = vst.msk [vmem:[%s1047_s3 + $0x8] sm:$0xff] %vm436_vm1, %v583_v28  ;;  %446 = vst.msk [vmem:[%s1047_s3 + $0x48] sm:$0xff] %vm436_vm1, %v583_v28  ;;  %v323_v30 = vmul.f32 %v694_v22, %v705_v25  ;;  %v331_v34 = vmul.f32 %v694_v22, %v714_v27  ;;  %v238_v62 = vmul.f32 %v902_v60, %v705_v25 }
  0xe2   :  { %420 = vst.msk [vmem:[%s1047_s3] sm:$0xff] %vm38_vm0, %v705_v25  ;;  %428 = vst.msk [vmem:[%s1047_s3 + $0x40] sm:$0xff] %vm38_vm0, %v714_v27  ;;  %v342_v29 = vsel %vm38_vm0, %v324_v26, 0.0  ;;  %v366_v63 = vsel %vm38_vm0, %v332_v59, 0.0  ;;  %v246_v11 = vmul.f32 %v902_v60, %v714_v27  ;;  %v257_v15 = vsel %vm38_vm0, %v239_v12, 0.0 }
  0xe3   :  { %437 = vst.msk [vmem:[%s1047_s3] sm:$0xff] %vm436_vm1, %v583_v28  ;;  %445 = vst.msk [vmem:[%s1047_s3 + $0x40] sm:$0xff] %vm436_vm1, %v583_v28  ;;  %343 = vadd.xlane.f32.xlu0 %v342_v29  ;;  %v745_v31 = vpop.f32.mrb[2].mxu0  ;;  %v747_v32 = vpop.f32.mrb[2].mxu1  ;;  %v339_v37 = vsel %vm38_vm0, %v323_v30, 0.0  ;;  %v363_v43 = vsel %vm38_vm0, %v331_v34, 0.0  ;;  %v247_v26 = vmul.f32 %v698_v24, %v902_v60 }
  0xe4   :  { %423 = vst.msk [vmem:[%s1047_s3 + $0x18] sm:$0xff] %vm38_vm0, %v745_v31  ;;  %v754_v33 = vpop.f32.mrb[3].mxu0  ;;  %431 = vst.msk [vmem:[%s1047_s3 + $0x58] sm:$0xff] %vm38_vm0, %v747_v32  ;;  %v763_v35 = vpop.f32.mrb[3].mxu1  ;;  %v326_v40 = vmul.f32 %v745_v31, %v694_v22  ;;  %v334_v0 = vmul.f32 %v747_v32, %v694_v22  ;;  %v254_v1 = vsel %vm38_vm0, %v238_v62, 0.0  ;;  %v278_v13 = vsel %vm38_vm0, %v246_v11, 0.0 }
  0xe5   :  { %440 = vst.msk [vmem:[%s1047_s3 + $0x18] sm:$0xff] %vm436_vm1, %v583_v28  ;;  %v325_v36 = vmul.f32 %v694_v22, %v754_v33  ;;  %448 = vst.msk [vmem:[%s1047_s3 + $0x58] sm:$0xff] %vm436_vm1, %v583_v28  ;;  %v333_v51 = vmul.f32 %v694_v22, %v763_v35  ;;  %v240_v2 = vmul.f32 %v902_v60, %v754_v33  ;;  %v281_v29 = vsel %vm38_vm0, %v247_v26, 0.0 }
  0xe6   :  { %422 = vst.msk [vmem:[%s1047_s3 + $0x10] sm:$0xff] %vm38_vm0, %v754_v33  ;;  %430 = vst.msk [vmem:[%s1047_s3 + $0x50] sm:$0xff] %vm38_vm0, %v763_v35  ;;  %v348_v46 = vsel %vm38_vm0, %v326_v40, 0.0  ;;  %v372_v3 = vsel %vm38_vm0, %v334_v0, 0.0  ;;  %v248_v14 = vmul.f32 %v902_v60, %v763_v35  ;;  %v241_v16 = vmul.f32 %v745_v31, %v902_v60 }
  0xe7   :  { %439 = vst.msk [vmem:[%s1047_s3 + $0x10] sm:$0xff] %vm436_vm1, %v583_v28  ;;  %447 = vst.msk [vmem:[%s1047_s3 + $0x50] sm:$0xff] %vm436_vm1, %v583_v28  ;;  %340 = vadd.xlane.f32.xlu0 %v339_v37  ;;  %v345_v38 = vsel %vm38_vm0, %v325_v36, 0.0  ;;  %v795_v39 = vpop.f32.mrb[4].mxu0  ;;  %v799_v41 = vpop.f32.mrb[4].mxu1  ;;  %v369_v56 = vsel %vm38_vm0, %v333_v51, 0.0  ;;  %v249_v30 = vmul.f32 %v747_v32, %v902_v60 }
  0xe8   :  { %346 = vadd.xlane.f32.xlu1 %v345_v38  ;;  %425 = vst.msk [vmem:[%s1047_s3 + $0x28] sm:$0xff] %vm38_vm0, %v795_v39  ;;  %v173_v42 = vpop.f32.mrb[5].mxu0  ;;  %433 = vst.msk [vmem:[%s1047_s3 + $0x68] sm:$0xff] %vm38_vm0, %v799_v41  ;;  %v812_v44 = vpop.f32.mrb[5].mxu1  ;;  %v328_v47 = vmul.f32 %v795_v39, %v694_v22  ;;  %v336_v4 = vmul.f32 %v799_v41, %v694_v22  ;;  %v260_v6 = vsel %vm38_vm0, %v240_v2, 0.0  ;;  %v284_v17 = vsel %vm38_vm0, %v248_v14, 0.0 }
  0xe9   :  { %442 = vst.msk [vmem:[%s1047_s3 + $0x28] sm:$0xff] %vm436_vm1, %v583_v28  ;;  %v327_v45 = vmul.f32 %v694_v22, %v173_v42  ;;  %450 = vst.msk [vmem:[%s1047_s3 + $0x68] sm:$0xff] %vm436_vm1, %v583_v28  ;;  %v335_v57 = vmul.f32 %v694_v22, %v812_v44  ;;  %v242_v7 = vmul.f32 %v902_v60, %v173_v42  ;;  %v263_v19 = vsel %vm38_vm0, %v241_v16, 0.0 }
  0xea   :  { %424 = vst.msk [vmem:[%s1047_s3 + $0x20] sm:$0xff] %vm38_vm0, %v173_v42  ;;  %432 = vst.msk [vmem:[%s1047_s3 + $0x60] sm:$0xff] %vm38_vm0, %v812_v44  ;;  %v354_v55 = vsel %vm38_vm0, %v328_v47, 0.0  ;;  %v378_v8 = vsel %vm38_vm0, %v336_v4, 0.0  ;;  %v250_v18 = vmul.f32 %v902_v60, %v812_v44  ;;  %v243_v20 = vmul.f32 %v795_v39, %v902_v60 }
  0xeb   :  { %441 = vst.msk [vmem:[%s1047_s3 + $0x20] sm:$0xff] %vm436_vm1, %v583_v28  ;;  %449 = vst.msk [vmem:[%s1047_s3 + $0x60] sm:$0xff] %vm436_vm1, %v583_v28  ;;  %364 = vadd.xlane.f32.xlu0 %v363_v43  ;;  %v843_v48 = vpop.f32.mrb[6].mxu0  ;;  %v845_v49 = vpop.f32.mrb[6].mxu1  ;;  %v351_v50 = vsel %vm38_vm0, %v327_v45, 0.0  ;;  %v375_v61 = vsel %vm38_vm0, %v335_v57, 0.0 }
  0xec   :  { %349 = vadd.xlane.f32.xlu1 %v348_v46  ;;  %427 = vst.msk [vmem:[%s1047_s3 + $0x38] sm:$0xff] %vm38_vm0, %v843_v48  ;;  %435 = vst.msk [vmem:[%s1047_s3 + $0x78] sm:$0xff] %vm38_vm0, %v845_v49  ;;  %v860_v52 = vpop.f32.mrb[7].mxu0  ;;  %v862_v53 = vpop.f32.mrb[7].mxu1  ;;  %v330_v54 = vmul.f32 %v843_v48, %v694_v22  ;;  %v338_v5 = vmul.f32 %v845_v49, %v694_v22  ;;  %v266_v10 = vsel %vm38_vm0, %v242_v7, 0.0  ;;  %v290_v23 = vsel %vm38_vm0, %v250_v18, 0.0 }
  0xed   :  { %444 = vst.msk [vmem:[%s1047_s3 + $0x38] sm:$0xff] %vm436_vm1, %v583_v28  ;;  %452 = vst.msk [vmem:[%s1047_s3 + $0x78] sm:$0xff] %vm436_vm1, %v583_v28  ;;  %v329_v21 = vmul.f32 %v694_v22, %v860_v52  ;;  %v269_v25 = vsel %vm38_vm0, %v243_v20, 0.0  ;;  %v337_v27 = vmul.f32 %v694_v22, %v862_v53  ;;  %v244_v33 = vmul.f32 %v902_v60, %v860_v52 }
  0xee   :  { %426 = vst.msk [vmem:[%s1047_s3 + $0x30] sm:$0xff] %vm38_vm0, %v860_v52  ;;  %434 = vst.msk [vmem:[%s1047_s3 + $0x70] sm:$0xff] %vm38_vm0, %v862_v53  ;;  %v360_v58 = vsel %vm38_vm0, %v330_v54, 0.0  ;;  %v384_v9 = vsel %vm38_vm0, %v338_v5, 0.0  ;;  %v287_v24 = vsel %vm38_vm0, %v249_v30, 0.0  ;;  %v251_v22 = vmul.f32 %v799_v41, %v902_v60 }
  0xef   :  { %443 = vst.msk [vmem:[%s1047_s3 + $0x30] sm:$0xff] %vm436_vm1, %v583_v28  ;;  %451 = vst.msk [vmem:[%s1047_s3 + $0x70] sm:$0xff] %vm436_vm1, %v583_v28  ;;  %352 = vadd.xlane.f32.xlu0 %v351_v50  ;;  %v357_v28 = vsel %vm38_vm0, %v329_v21, 0.0  ;;  %v381_v31 = vsel %vm38_vm0, %v337_v27, 0.0  ;;  %v252_v34 = vmul.f32 %v902_v60, %v862_v53  ;;  %v272_v35 = vsel %vm38_vm0, %v244_v33, 0.0 }
  0xf0   :  { %355 = vadd.xlane.f32.xlu1 %v354_v55  ;;  %v293_v32 = vsel %vm38_vm0, %v251_v22, 0.0  ;;  %v245_v36 = vmul.f32 %v843_v48, %v902_v60  ;;  %v253_v38 = vmul.f32 %v845_v49, %v902_v60 }
  0xf1   :  { %v296_v37 = vsel %vm38_vm0, %v252_v34, 0.0 }
  0xf2   :  { %v275_v39 = vsel %vm38_vm0, %v245_v36, 0.0  ;;  %v299_v40 = vsel %vm38_vm0, %v253_v38, 0.0 }
  0xf3   :  { %370 = vadd.xlane.f32.xlu0 %v369_v56 }
  0xf4   :  { %361 = vadd.xlane.f32.xlu1 %v360_v58 }
  0xf7   :  { %376 = vadd.xlane.f32.xlu0 %v375_v61 }
  0xf8   :  { %367 = vadd.xlane.f32.xlu1 %v366_v63 }
  0xfb   :  { %255 = vadd.xlane.f32.xlu0 %v254_v1 }
  0xfc   :  { %373 = vadd.xlane.f32.xlu1 %v372_v3 }
  0xff   :  { %261 = vadd.xlane.f32.xlu0 %v260_v6 }
 0x100   :  { %379 = vadd.xlane.f32.xlu1 %v378_v8 }
 0x103   :  { %267 = vadd.xlane.f32.xlu0 %v266_v10 }
 0x104   :  { %385 = vadd.xlane.f32.xlu1 %v384_v9 }
 0x107   :  { %279 = vadd.xlane.f32.xlu0 %v278_v13 }
 0x108   :  { %258 = vadd.xlane.f32.xlu1 %v257_v15 }
 0x10b   :  { %285 = vadd.xlane.f32.xlu0 %v284_v17 }
 0x10c   :  { %264 = vadd.xlane.f32.xlu1 %v263_v19 }
 0x10f   :  { %291 = vadd.xlane.f32.xlu0 %v290_v23 }
 0x110   :  { %270 = vadd.xlane.f32.xlu1 %v269_v25 }
 0x113   :  { %358 = vadd.xlane.f32.xlu0 %v357_v28 }
 0x114   :  { %282 = vadd.xlane.f32.xlu1 %v281_v29 }
 0x117   :  { %382 = vadd.xlane.f32.xlu0 %v381_v31 }
 0x118   :  { %288 = vadd.xlane.f32.xlu1 %v287_v24 }
 0x11b   :  { %273 = vadd.xlane.f32.xlu0 %v272_v35 }
 0x11c   :  { %294 = vadd.xlane.f32.xlu1 %v293_v32 }
 0x11f   :  { %297 = vadd.xlane.f32.xlu0 %v296_v37 }
 0x120   :  { %276 = vadd.xlane.f32.xlu1 %v275_v39 }
 0x124   :  { %300 = vadd.xlane.f32.xlu1 %v299_v40 }
 0x170   :  { %v344_v41 = vpop.xlane.xlu0 %343 }
 0x174   :  { %v341_v42 = vpop.xlane.xlu0 %340 }
 0x175   :  { %v347_v43 = vpop.xlane.xlu1 %346  ;;  %387 = vxpose.xlu0.b32.start [1/16] (narrow) %v341_v42, 8 }
 0x178   :  { %v365_v44 = vpop.xlane.xlu0 %364 }
 0x179   :  { %v350_v45 = vpop.xlane.xlu1 %349  ;;  %388 = vxpose.xlu0.b32.cont [2/16] (narrow) %v344_v41, 8 }
 0x17c   :  { %v353_v46 = vpop.xlane.xlu0 %352 }
 0x17d   :  { %v356_v47 = vpop.xlane.xlu1 %355  ;;  %389 = vxpose.xlu0.b32.cont [3/16] (narrow) %v347_v43, 8 }
 0x180   :  { %v371_v48 = vpop.xlane.xlu0 %370 }
 0x181   :  { %v362_v50 = vpop.xlane.xlu1 %361  ;;  %390 = vxpose.xlu0.b32.cont [4/16] (narrow) %v350_v45, 8 }
 0x184   :  { %v377_v49 = vpop.xlane.xlu0 %376 }
 0x185   :  { %v368_v51 = vpop.xlane.xlu1 %367  ;;  %391 = vxpose.xlu0.b32.cont [5/16] (narrow) %v353_v46, 8 }
 0x188   :  { %v256_v52 = vpop.xlane.xlu0 %255 }
 0x189   :  { %303 = vst.msk [vmem:[%s1048_s4] sm:$0xff] %vm302_vm2, %v256_v52  ;;  %v374_v53 = vpop.xlane.xlu1 %373  ;;  %392 = vxpose.xlu0.b32.cont [6/16] (narrow) %v356_v47, 8 }
 0x18c   :  { %v262_v54 = vpop.xlane.xlu0 %261 }
 0x18d   :  { %305 = vst.msk [vmem:[%s1048_s4 + $0x10] sm:$0xff] %vm302_vm2, %v262_v54  ;;  %v380_v55 = vpop.xlane.xlu1 %379 }
 0x190   :  { %v268_v56 = vpop.xlane.xlu0 %267 }
 0x191   :  { %307 = vst.msk [vmem:[%s1048_s4 + $0x20] sm:$0xff] %vm302_vm2, %v268_v56  ;;  %v386_v57 = vpop.xlane.xlu1 %385 }
 0x194   :  { %v280_v58 = vpop.xlane.xlu0 %279 }
 0x195   :  { %311 = vst.msk [vmem:[%s1048_s4 + $0x40] sm:$0xff] %vm302_vm2, %v280_v58  ;;  %v259_v59 = vpop.xlane.xlu1 %258 }
 0x196   :  { %304 = vst.msk [vmem:[%s1048_s4 + $0x8] sm:$0xff] %vm302_vm2, %v259_v59 }
 0x198   :  { %v286_v60 = vpop.xlane.xlu0 %285 }
 0x199   :  { %313 = vst.msk [vmem:[%s1048_s4 + $0x50] sm:$0xff] %vm302_vm2, %v286_v60  ;;  %v265_v61 = vpop.xlane.xlu1 %264 }
 0x19a   :  { %306 = vst.msk [vmem:[%s1048_s4 + $0x18] sm:$0xff] %vm302_vm2, %v265_v61 }
 0x19c   :  { %v292_v62 = vpop.xlane.xlu0 %291 }
 0x19d   :  { %315 = vst.msk [vmem:[%s1048_s4 + $0x60] sm:$0xff] %vm302_vm2, %v292_v62  ;;  %v271_v63 = vpop.xlane.xlu1 %270 }
 0x19e   :  { %308 = vst.msk [vmem:[%s1048_s4 + $0x28] sm:$0xff] %vm302_vm2, %v271_v63 }
 0x1a0   :  { %v359_v0 = vpop.xlane.xlu0 %358 }
 0x1a1   :  { %v283_v1 = vpop.xlane.xlu1 %282  ;;  %393 = vxpose.xlu0.b32.cont [7/16] (narrow) %v359_v0, 8 }
 0x1a2   :  { %312 = vst.msk [vmem:[%s1048_s4 + $0x48] sm:$0xff] %vm302_vm2, %v283_v1 }
 0x1a4   :  { %v383_v2 = vpop.xlane.xlu0 %382 }
 0x1a5   :  { %v289_v3 = vpop.xlane.xlu1 %288  ;;  %394 = vxpose.xlu0.b32.cont [8/16] (narrow) %v362_v50, 8 }
 0x1a6   :  { %314 = vst.msk [vmem:[%s1048_s4 + $0x58] sm:$0xff] %vm302_vm2, %v289_v3 }
 0x1a8   :  { %v274_v4 = vpop.xlane.xlu0 %273 }
 0x1a9   :  { %309 = vst.msk [vmem:[%s1048_s4 + $0x30] sm:$0xff] %vm302_vm2, %v274_v4  ;;  %v295_v5 = vpop.xlane.xlu1 %294  ;;  %395 = vxpose.xlu0.b32.cont [9/16] (narrow) %v365_v44, 8 }
 0x1aa   :  { %316 = vst.msk [vmem:[%s1048_s4 + $0x68] sm:$0xff] %vm302_vm2, %v295_v5 }
 0x1ac   :  { %v298_v6 = vpop.xlane.xlu0 %297 }
 0x1ad   :  { %v277_v7 = vpop.xlane.xlu1 %276  ;;  %396 = vxpose.xlu0.b32.cont [10/16] (narrow) %v368_v51, 8  ;;  %317 = vst.msk [vmem:[%s1048_s4 + $0x70] sm:$0xff] %vm302_vm2, %v298_v6 }
 0x1ae   :  { %310 = vst.msk [vmem:[%s1048_s4 + $0x38] sm:$0xff] %vm302_vm2, %v277_v7 }
 0x1b1   :  { %397 = vxpose.xlu0.b32.cont [11/16] (narrow) %v371_v48, 8  ;;  %v301_v8 = vpop.xlane.xlu1 %300 }
 0x1b2   :  { %318 = vst.msk [vmem:[%s1048_s4 + $0x78] sm:$0xff] %vm302_vm2, %v301_v8 }
 0x1b5   :  { %398 = vxpose.xlu0.b32.cont [12/16] (narrow) %v374_v53, 8 }
 0x1b9   :  { %399 = vxpose.xlu0.b32.cont [13/16] (narrow) %v377_v49, 8 }
 0x1bd   :  { %400 = vxpose.xlu0.b32.cont [14/16] (narrow) %v380_v55, 8 }
 0x1c1   :  { %401 = vxpose.xlu0.b32.cont [15/16] (narrow) %v383_v2, 8 }
 0x1c5   :  { %402 = vxpose.xlu0.b32.end [16/16] (narrow) %v386_v57, 8 }
 0x209   :  { %v403_v9 = vpop.trf.xlu0 }
 0x20a   :  { %419 = vst [vmem:[#allocation2] sm:$0x1] %v403_v9 }
 0x20b   :  { %570 = shalt.err (!%p567_p4)
}
 0x20c   :  { %s571_s25 = scalar_lea.hbm %s1049_s5, 16 }
 0x20d   :  { %p572_p5 = scmp.ne.s32.totalorder %s1049_s5, %s571_s25  ;;  %p575_p6 = scmp.lt.u32.totalorder %s571_s25, %s1049_s5 }
 0x20f   :  { %p577_p7 = pnand %p575_p6, %p572_p5 }
 0x211   :  { %580 = shalt.err (!%p577_p7)
}
 0x212   :  { %466 = dma.vmem_to_hbm [thread:$0]  %s464_s21, 16, %s1049_s5, [#allocation3]  }
 0x213   :  { %581 = dma.done.wait [#allocation3], 16  }
 0x214   :  { %582 = vsyncadd [#allocation3], 4294967280 }
 0x215   :  { %474 = vsyncpa [#allocation3], 1 }

</bundles_post_ra>
